<compile_context>
chip_gen: v5e
topology: v5e:2x2
jax: 0.10.0
libtpu: 0.0.40
codegen_flags: <defaults>
</compile_context>

<pallas_src>
import functools

import jax
import jax.numpy as jnp
from jax.experimental import pallas as pl
from jax.experimental.pallas import tpu as pltpu


def _triplet_loss_kernel(a_ref, p_ref, n_ref, o_ref, *, margin, batch,
                         block_rows):
    i = pl.program_id(0)

    a = a_ref[...].astype(jnp.float32)
    p = p_ref[...].astype(jnp.float32)
    n = n_ref[...].astype(jnp.float32)

    # pos_dist - neg_dist, fused into a single per-row reduce:
    #   (a-p)^2 - (a-n)^2 = (n - p) * (2a - p - n)
    diff = jnp.sum((n - p) * (2.0 * a - p - n), axis=1, keepdims=True)  # (TB,1)

    # F.relu(pos - neg + margin)
    hinge = jnp.maximum(diff + margin, 0.0)

    # Mask padded rows in the (possibly partial) last tile.
    rows = i * block_rows + jax.lax.broadcasted_iota(jnp.int32, hinge.shape, 0)
    hinge = jnp.where(rows < batch, hinge, 0.0)

    # Per-block partial sum; the mean (sum / B) happens in the wrapper.
    o_ref[...] = jnp.sum(hinge).reshape(1, 1)


def triplet_loss(anchor, positive, negative, margin=1.0):
    assert anchor.shape == positive.shape == negative.shape
    assert anchor.ndim == 2, "expected (B, D) inputs"
    B, D = anchor.shape

    # Tile over batch: keep each (TB, D) f32 input tile around <= 4 MiB so
    # 3 inputs x 2 pipeline buffers stay ~24 MiB (fits v7x's 64 MiB VMEM and
    # leaves headroom on v5e/v6e).
    max_tile_elems = 1 << 20                       # ~4 MiB of f32 per tile
    tb = max(8, min(4096, (max_tile_elems // max(D, 1)) // 8 * 8))
    if B <= tb:
        tb = B                                     # full-dim block: always legal
    num_blocks = pl.cdiv(B, tb)

    kernel = functools.partial(
        _triplet_loss_kernel,
        margin=float(margin),
        batch=B,
        block_rows=tb,
    )

    in_spec = pl.BlockSpec((tb, D), lambda i: (i, 0))
    partial_sums = pl.pallas_call(
        kernel,
        out_shape=jax.ShapeDtypeStruct((num_blocks, 1), jnp.float32),
        grid=(num_blocks,),
        in_specs=[in_spec, in_spec, in_spec],
        out_specs=pl.BlockSpec((1, 1), lambda i: (i, 0)),
        compiler_params=pltpu.CompilerParams(
            dimension_semantics=("parallel",),
            vmem_limit_bytes=48 * 1024 * 1024,
        ),
    )(anchor, positive, negative)

    # .mean() over the true batch size.
    return jnp.sum(partial_sums) / B


if __name__ == "__main__":
    key = jax.random.PRNGKey(0)
    k_a, k_p, k_n = jax.random.split(key, 3)

    B, D = 8, 32
    anchor = jax.random.normal(k_a, (B, D), dtype=jnp.float32)
    positive = jax.random.normal(k_p, (B, D), dtype=jnp.float32)
    negative = jax.random.normal(k_n, (B, D), dtype=jnp.float32)

    loss = triplet_loss(anchor, positive, negative, margin=1.0)
    jax.block_until_ready(loss)

    # Pure-JAX reference check of the same semantics.
    pos_d = jnp.sum((anchor - positive) ** 2, axis=1)
    neg_d = jnp.sum((anchor - negative) ** 2, axis=1)
    ref = jnp.mean(jnp.maximum(pos_d - neg_d + 1.0, 0.0))
    assert jnp.allclose(loss, ref, rtol=1e-5, atol=1e-5), (loss, ref)

    print("KERNEL_OK")
</pallas_src>

<mosaic_0001>
module attributes {stable_mosaic.version = 11 : i64} {
  func.func @_triplet_loss_kernel(%arg0: i32, %arg1: memref<8x32xf32, #tpu.memory_space<vmem>>, %arg2: memref<8x32xf32, #tpu.memory_space<vmem>>, %arg3: memref<8x32xf32, #tpu.memory_space<vmem>>, %arg4: memref<1x1xf32, #tpu.memory_space<vmem>>) attributes {dimension_semantics = [#tpu.dimension_semantics<parallel>], iteration_bounds = array<i64: 1>, scalar_prefetch = 0 : i64, scratch_operands = 0 : i64, tpu.core_type = #tpu.core_type<tc>, window_params = [{transform_indices = @transform_0, window_bounds = array<i64: 8, 32>}, {transform_indices = @transform_1, window_bounds = array<i64: 8, 32>}, {transform_indices = @transform_2, window_bounds = array<i64: 8, 32>}, {transform_indices = @transform_3, window_bounds = array<i64: 1, 1>}]} {
    %c0 = arith.constant 0 : index
    %c0_0 = arith.constant 0 : index
    %0 = vector.load %arg1[%c0, %c0_0] : memref<8x32xf32, #tpu.memory_space<vmem>>, vector<8x32xf32>
    %c0_1 = arith.constant 0 : index
    %c0_2 = arith.constant 0 : index
    %1 = vector.load %arg2[%c0_1, %c0_2] : memref<8x32xf32, #tpu.memory_space<vmem>>, vector<8x32xf32>
    %c0_3 = arith.constant 0 : index
    %c0_4 = arith.constant 0 : index
    %2 = vector.load %arg3[%c0_3, %c0_4] : memref<8x32xf32, #tpu.memory_space<vmem>>, vector<8x32xf32>
    %3 = arith.subf %2, %1 : vector<8x32xf32>
    %cst = arith.constant 2.000000e+00 : f32
    %4 = vector.broadcast %cst : f32 to vector<8x32xf32>
    %5 = arith.mulf %4, %0 : vector<8x32xf32>
    %6 = arith.subf %5, %1 : vector<8x32xf32>
    %7 = arith.subf %6, %2 : vector<8x32xf32>
    %8 = arith.mulf %3, %7 : vector<8x32xf32>
    %cst_5 = arith.constant dense<0.000000e+00> : vector<8xf32>
    %9 = vector.multi_reduction <add>, %8, %cst_5 [1] : vector<8x32xf32> to vector<8xf32>
    %10 = vector.shape_cast %9 : vector<8xf32> to vector<8x1xf32>
    %cst_6 = arith.constant 1.000000e+00 : f32
    %11 = vector.broadcast %cst_6 : f32 to vector<8x1xf32>
    %12 = arith.addf %10, %11 : vector<8x1xf32>
    %cst_7 = arith.constant 0.000000e+00 : f32
    %13 = vector.broadcast %cst_7 : f32 to vector<8x1xf32>
    %14 = arith.maximumf %12, %13 : vector<8x1xf32>
    %c8_i32 = arith.constant 8 : i32
    %15 = arith.muli %arg0, %c8_i32 : i32
    %16 = tpu.iota {dimensions = array<i32: 0>} : vector<8x1xi32>
    %17 = vector.broadcast %15 : i32 to vector<8x1xi32>
    %18 = arith.addi %17, %16 : vector<8x1xi32>
    %c8_i32_8 = arith.constant 8 : i32
    %19 = vector.broadcast %c8_i32_8 : i32 to vector<8x1xi32>
    %20 = arith.cmpi slt, %18, %19 : vector<8x1xi32>
    %cst_9 = arith.constant 0.000000e+00 : f32
    %21 = vector.broadcast %cst_9 : f32 to vector<8x1xf32>
    %22 = arith.select %20, %14, %21 : vector<8x1xi1>, vector<8x1xf32>
    %23 = vector.shape_cast %22 : vector<8x1xf32> to vector<1x8x1xf32>
    %cst_10 = arith.constant dense<0.000000e+00> : vector<1xf32>
    %24 = vector.multi_reduction <add>, %23, %cst_10 [1, 2] : vector<1x8x1xf32> to vector<1xf32>
    %25 = vector.shape_cast %24 : vector<1xf32> to vector<1x1x1xf32>
    %26 = vector.extract %25[0, 0, 0] : f32 from vector<1x1x1xf32>
    %27 = vector.broadcast %26 : f32 to vector<1x1xf32>
    %c0_11 = arith.constant 0 : index
    %c0_12 = arith.constant 0 : index
    %28 = vector.load %arg4[%c0_11, %c0_12] : memref<1x1xf32, #tpu.memory_space<vmem>>, vector<1x1xf32>
    tpu.vector_store %arg4[%c0_11, %c0_12], %27 {strides = array<i32>} : memref<1x1xf32, #tpu.memory_space<vmem>>, vector<1x1xf32>,
    return
  }
  func.func @transform_0(%arg0: i32) -> (i32, i32) {
    %c0_i32 = arith.constant 0 : i32
    %c0_i32_0 = arith.constant 0 : i32
    return %arg0, %c0_i32 : i32, i32
  }
  func.func @transform_1(%arg0: i32) -> (i32, i32) {
    %c0_i32 = arith.constant 0 : i32
    %c0_i32_0 = arith.constant 0 : i32
    return %arg0, %c0_i32 : i32, i32
  }
  func.func @transform_2(%arg0: i32) -> (i32, i32) {
    %c0_i32 = arith.constant 0 : i32
    %c0_i32_0 = arith.constant 0 : i32
    return %arg0, %c0_i32 : i32, i32
  }
  func.func @transform_3(%arg0: i32) -> (i32, i32) {
    %c0_i32 = arith.constant 0 : i32
    %c0_i32_0 = arith.constant 0 : i32
    return %arg0, %c0_i32 : i32, i32
  }
}

</mosaic_0001>

<bundles_post_ra>
// kernel: tpu_custom_call.1
= control target key start
LH: loop header
LB: loop body
LE: loop exit
PB: predicated region body
PF: predicated region fallthrough
CT: control target
= control target key end

     0   :  { %8 = vsyncpa [#allocation3], 0  ;;  %s253_s0 = inlined_call_operand.hbm [shape: f32[8,32], index: 0, kind: input, shape index: {}]   ;;  %s254_s1 = inlined_call_operand.hbm [shape: f32[8,32], index: 1, kind: input, shape index: {}]   ;;  %s255_s2 = inlined_call_operand.hbm [shape: f32[8,32], index: 2, kind: input, shape index: {}]   ;;  %s256_s3 = inlined_call_operand.hbm [shape: f32[1,1], index: 3, kind: output, shape index: {}]  }
   0x1   :  { %9 = vsyncpa [#allocation6], 0  ;;  %s27_s14 = sshll.u32 %s254_s1, 4  ;;  %s28_s14 = int_to_ptr.hbm [resolvable:$true] %s27_s14 }
   0x2   :  { %10 = vsyncpa [#allocation4], 0  ;;  %s217_s15 = smov [#allocation5]   ;;  %s16_s19 = sshll.u32 %s253_s0, 4  ;;  %s17_s19 = int_to_ptr.hbm [resolvable:$true] %s16_s19 }
   0x3   :  { %s29_s16 = sshll.u32 %s217_s15, 4  ;;  %s218_s20 = smov [#allocation2]   ;;  %s30_s16 = int_to_ptr.vmem [resolvable:$true] %s29_s16 }
   0x4   :  { %32 = dma.hbm_to_vmem [thread:$0]  %s28_s14, 128, %s30_s16, [#allocation6]  }
   0x5   :  { %s18_s21 = sshll.u32 %s218_s20, 4  ;;  %s38_s24 = sshll.u32 %s255_s2, 4  ;;  %s19_s21 = int_to_ptr.vmem [resolvable:$true] %s18_s21  ;;  %s39_s24 = int_to_ptr.hbm [resolvable:$true] %s38_s24 }
   0x6   :  { %21 = dma.hbm_to_vmem [thread:$0]  %s17_s19, 128, %s19_s21, [#allocation3]  }
   0x7   :  { %s219_s1 = smov [#allocation7]  }
   0x8   :  { %s40_s25 = sshll.u32 %s219_s1, 4  ;;  %s41_s25 = int_to_ptr.vmem [resolvable:$true] %s40_s25 }
   0x9   :  { %43 = dma.hbm_to_vmem [thread:$0]  %s39_s24, 128, %s41_s25, [#allocation6]  }
   0xa   :  { %211 = dma.done.wait [#allocation3], 128  }
   0xb   :  { %212 = vsyncadd [#allocation3], 4294967168 }
   0xc   :  { %213 = dma.done.wait [#allocation6], 256  }
   0xd   :  { %214 = vsyncadd [#allocation6], 4294967040  ;;  %v56_v0 = vld [vmem:[#allocation2] sm:$0xff]  ;;  %v57_v1 = vld [vmem:[#allocation5] sm:$0xff]  ;;  %vm64_vm0 = vcmask 261120   ;;  %vm77_vm1 = vcmask 7168  }
   0xe   :  { %v58_v2 = vld [vmem:[#allocation7] sm:$0xff]  ;;  %v60_v3 = vmul.f32 2.0, %v56_v0  ;;  %s220_s0 = smov [#allocation8]   ;;  %s98_s28 = sshll.u32 %s256_s3, 4  ;;  %vm89_vm2 = vcmask 0   ;;  %s99_s28 = int_to_ptr.hbm [resolvable:$true] %s98_s28 }
   0xf   :  { %v59_v4 = vsub.f32 %v58_v2, %v57_v1  ;;  %s96_s2 = sshll.u32 %s220_s0, 4  ;;  %s97_s2 = int_to_ptr.vmem [resolvable:$true] %s96_s2 }
  0x10   :  { %v61_v5 = vsub.f32 %v60_v3, %v57_v1 }
  0x12   :  { %v62_v6 = vsub.f32 %v61_v5, %v58_v2 }
  0x14   :  { %v63_v7 = vmul.f32 %v62_v6, %v59_v4 }
  0x16   :  { %v65_v8 = vsel %vm64_vm0, %v63_v7, 0.0 }
  0x17   :  { %66 = vadd.xlane.f32.xlu0 %v65_v8 }
  0x8a   :  { %v67_v9 = vpop.xlane.xlu0 %66 }
  0x8b   :  { %v68_v10 = vadd.f32 1.0, %v67_v9 }
  0x8d   :  { %v69_v11 = vmax.f32 %v68_v10, 0.0 }
  0x8f   :  { %v78_v12 = vsel %vm77_vm1, %v69_v11, 0.0 }
  0x90   :  { %79 = vadd.xlane.f32.xlu0 %v78_v12 }
 0x103   :  { %v80_v13 = vpop.xlane.xlu0 %79 }
 0x104   :  { %v81_v14 = vrot.slane %v80_v13, 4 }
 0x106   :  { %v82_v15 = vadd.f32 %v81_v14, %v80_v13 }
 0x108   :  { %v83_v16 = vrot.slane %v82_v15, 2 }
 0x10a   :  { %v84_v17 = vadd.f32 %v83_v16, %v82_v15 }
 0x10c   :  { %v85_v18 = vrot.slane %v84_v17, 1 }
 0x10e   :  { %v86_v19 = vadd.f32 %v85_v18, %v84_v17 }
 0x110   :  { %109 = vpush %v86_v19 }
 0x141   :  { %s110_s29 = spop %109 }
 0x142   :  { %v88_v20 = vstv %s110_s29 }
 0x143   :  { %90 = vst.msk [vmem:[#allocation8] sm:$0x1] %vm89_vm2, %v88_v20 }
 0x144   :  { %101 = dma.vmem_to_hbm [thread:$0]  %s97_s2, 16, %s99_s28, [#allocation4]  }
 0x145   :  { %215 = dma.done.wait [#allocation4], 16  }
 0x146   :  { %216 = vsyncadd [#allocation4], 4294967280 }
 0x147   :  { %106 = vsyncpa [#allocation3], 1 }
 0x148   :  { %107 = vsyncpa [#allocation6], 1 }
 0x149   :  { %108 = vsyncpa [#allocation4], 1 }

</bundles_post_ra>
